<compile_context>
chip_gen: v7x
topology: tpu7x:2x2x1
jax: 0.10.0
libtpu: 0.0.40
codegen_flags: <defaults>
</compile_context>

<pallas_src>
import functools

import jax
import jax.numpy as jnp
from jax.experimental import pallas as pl
from jax.experimental.pallas import tpu as pltpu


def _round_up(x: int, m: int) -> int:
    return ((x + m - 1) // m) * m


def _pick_div_tile(padded_dim: int, candidates) -> int:
    """Largest candidate tile that exactly divides padded_dim."""
    for c in candidates:
        if padded_dim % c == 0:
            return c
    return padded_dim  # unreachable for 128-multiples with 128 in candidates


# 256-aligned candidates first (v6e/v7x MXU is 2x256x256); 384 only beats 128.
_TK_CANDIDATES = (2048, 1024, 512, 256, 384, 128)
_TN_CANDIDATES = (1024, 512, 256, 384, 128)
_TM_CANDIDATES = (512, 256, 128)


def _vmem_budget_bytes() -> int:
    """~3/4 of physical VMEM (48 MiB on v7x, 96 MiB on v5e/v6e); safe fallback."""
    cap = None
    try:
        cap = int(pltpu.get_tpu_info().vmem_capacity_bytes)
    except Exception:
        cap = None
    if not cap or cap <= 0:
        cap = 64 << 20  # conservative: v7x per-TC VMEM
    return min((cap * 3) // 4, 112 << 20)


# ---------------------------------------------------------------------------
# Kernels. Grid = (M/tm, N/tn, K/tk), K innermost ("arbitrary"); the output
# block index ignores k, so the output tile is VMEM-resident across the whole
# reduction (accumulator pattern).
# ---------------------------------------------------------------------------
def _mm_kernel_direct(x_ref, w_ref, o_ref):
    """No bias, f32 output: accumulate directly into the resident output tile."""

    @pl.when(pl.program_id(2) == 0)
    def _():
        o_ref[...] = jnp.zeros_like(o_ref)

    o_ref[...] += jnp.dot(
        x_ref[...], w_ref[...], preferred_element_type=jnp.float32
    )


def _mm_bias_kernel_direct(x_ref, w_ref, b_ref, o_ref):
    """Bias folded into the k==0 init; f32 output, no scratch, no epilogue."""

    @pl.when(pl.program_id(2) == 0)
    def _():
        o_ref[...] = jnp.broadcast_to(
            b_ref[...].astype(o_ref.dtype), o_ref.shape
        )

    o_ref[...] += jnp.dot(
        x_ref[...], w_ref[...], preferred_element_type=jnp.float32
    )


def _mm_kernel_scratch(x_ref, w_ref, o_ref, acc_ref):
    """No bias, non-f32 output: f32 scratch accumulator + cast-store epilogue."""
    k = pl.program_id(2)

    @pl.when(k == 0)
    def _():
        acc_ref[...] = jnp.zeros_like(acc_ref)

    acc_ref[...] += jnp.dot(
        x_ref[...], w_ref[...], preferred_element_type=jnp.float32
    )

    @pl.when(k == pl.num_programs(2) - 1)
    def _():
        o_ref[...] = acc_ref[...].astype(o_ref.dtype)


def _mm_bias_kernel_scratch(x_ref, w_ref, b_ref, o_ref, acc_ref):
    """Bias folded into acc init at k==0; non-f32 output via cast epilogue."""
    k = pl.program_id(2)

    @pl.when(k == 0)
    def _():
        acc_ref[...] = jnp.broadcast_to(
            b_ref[...].astype(jnp.float32), acc_ref.shape
        )

    acc_ref[...] += jnp.dot(
        x_ref[...], w_ref[...], preferred_element_type=jnp.float32
    )

    @pl.when(k == pl.num_programs(2) - 1)
    def _():
        o_ref[...] = acc_ref[...].astype(o_ref.dtype)


# ---------------------------------------------------------------------------
# One jitted function does: cast -> pad -> pallas_call -> slice -> reshape,
# so XLA fuses the activation pad / output slice with the custom call instead
# of running them as standalone full-HBM copies.
# ---------------------------------------------------------------------------
@functools.partial(
    jax.jit,
    static_argnames=(
        "tm",
        "tn",
        "tk",
        "n_out",
        "out_dtype",
        "compute_dtype",
        "vmem_limit",
    ),
)
def _linear_forward(
    x, w_t, bias_row, *, tm, tn, tk, n_out, out_dtype, compute_dtype, vmem_limit
):
    out_dt = jnp.dtype(out_dtype)
    cmp_dt = jnp.dtype(compute_dtype)

    lead = x.shape[:-1]
    K = x.shape[-1]
    x2d = x.reshape(-1, K)
    M = x2d.shape[0]
    k_pad, n_pad = w_t.shape

    if x2d.dtype != cmp_dt:
        x2d = x2d.astype(cmp_dt)

    m_pad = _round_up(M, tm)
    if m_pad != M or k_pad != K:
        # Zero pad rows/cols are inert in the reduction and sliced off below.
        x2d = jnp.pad(x2d, ((0, m_pad - M), (0, k_pad - K)))

    assert m_pad % tm == 0 and n_pad % tn == 0 and k_pad % tk == 0
    grid = (m_pad // tm, n_pad // tn, k_pad // tk)

    has_bias = bias_row is not None
    direct = out_dt == jnp.dtype(jnp.float32)

    in_specs = [
        pl.BlockSpec((tm, tk), lambda i, j, k: (i, k)),
        pl.BlockSpec((tk, tn), lambda i, j, k: (k, j)),
    ]
    args = [x2d, w_t]
    if has_bias:
        in_specs.append(pl.BlockSpec((1, tn), lambda i, j, k: (0, j)))
        args.append(bias_row)

    if direct:
        kernel = _mm_bias_kernel_direct if has_bias else _mm_kernel_direct
        scratch = []
    else:
        kernel = _mm_bias_kernel_scratch if has_bias else _mm_kernel_scratch
        scratch = [pltpu.VMEM((tm, tn), jnp.float32)]

    in_b = cmp_dt.itemsize
    out_b = out_dt.itemsize
    cost = pl.CostEstimate(
        flops=2 * m_pad * n_pad * k_pad,
        transcendentals=0,
        bytes_accessed=(
            m_pad * k_pad * in_b + k_pad * n_pad * in_b + m_pad * n_pad * out_b
        ),
    )

    y2d = pl.pallas_call(
        kernel,
        out_shape=jax.ShapeDtypeStruct((m_pad, n_pad), out_dt),
        grid_spec=pltpu.PrefetchScalarGridSpec(
            num_scalar_prefetch=0,
            grid=grid,
            in_specs=in_specs,
            out_specs=pl.BlockSpec((tm, tn), lambda i, j, k: (i, j)),
            scratch_shapes=scratch,
        ),
        compiler_params=pltpu.CompilerParams(
            dimension_semantics=("parallel", "parallel", "arbitrary"),
            vmem_limit_bytes=vmem_limit,
        ),
        cost_estimate=cost,
    )(*args)

    y2d = y2d[:M, :n_out]
    return y2d.reshape(*lead, n_out)


# ---------------------------------------------------------------------------
# Module wrapper: JAX/Pallas equivalent of sglang LinearBase (unquantized).
# ---------------------------------------------------------------------------
class LinearBasePallas:
    """forward(x) returns (output, output_bias):
      - skip_bias_add=False: output = x @ W^T + b, output_bias = None
      - skip_bias_add=True : output = x @ W^T,     output_bias = b
    """

    # TODO(synk): quant_config / QuantizeMethodBase dispatch is not translated;
    # only the UnquantizedLinearMethod forward is implemented.  (On v7x an fp8
    # weight path, on v5e/v6e an int8 path, would be the quantized analogue.)

    def __init__(
        self,
        input_size: int,
        output_size: int,
        bias: bool = True,
        skip_bias_add: bool = False,
        params_dtype=jnp.float32,
        compute_dtype=jnp.bfloat16,  # bf16 MXU inputs, f32 accumulation
        out_dtype=None,              # default: params_dtype
        free_source_weight: bool = False,
        seed: int = 0,
    ):
        self.input_size = input_size
        self.output_size = output_size
        self.skip_bias_add = skip_bias_add
        self.params_dtype = params_dtype
        self.compute_dtype = compute_dtype
        self.out_dtype = params_dtype if out_dtype is None else out_dtype

        key = jax.random.PRNGKey(seed)
        kw, kb = jax.random.split(key)
        # PyTorch convention: weight shape (output_size, input_size).
        self.weight = (
            jax.random.normal(kw, (output_size, input_size), dtype=jnp.float32)
            * 0.02
        ).astype(params_dtype)
        self.bias = (
            (
                jax.random.normal(kb, (output_size,), dtype=jnp.float32) * 0.02
            ).astype(params_dtype)
            if bias
            else None
        )

        # --- cache transposed + padded weight ONCE in compute dtype --------
        K, N = input_size, output_size
        k_pad = _round_up(K, 128)
        n_pad = _round_up(N, 128)
        self._k_pad, self._n_pad = k_pad, n_pad
        self._tk_opts = [c for c in _TK_CANDIDATES if k_pad % c == 0] or [k_pad]
        self._tn_opts = [c for c in _TN_CANDIDATES if n_pad % c == 0] or [n_pad]
        self._vmem_budget = _vmem_budget_bytes()

        w_t = self.weight.astype(self.compute_dtype).T  # (K, N)
        if (k_pad, n_pad) != (K, N):
            w_t = jnp.pad(w_t, ((0, k_pad - K), (0, n_pad - N)))
        self._w_t = jax.block_until_ready(w_t)

        # Bias stays in f32 (never rounded to compute_dtype).
        if (self.bias is not None) and (not skip_bias_add):
            b_row = self.bias.astype(jnp.float32).reshape(1, N)
            if n_pad != N:
                b_row = jnp.pad(b_row, ((0, 0), (0, n_pad - N)))
            self._bias_row = jax.block_until_ready(b_row)
        else:
            self._bias_row = None

        if free_source_weight:
            # Avoid holding both layouts in HBM (production setting).
            self.weight = None

    def forward(self, x):
        assert x.shape[-1] == self.input_size

        M = 1
        for d in x.shape[:-1]:
            M *= int(d)
        M = max(M, 1)

        cmp_dt = jnp.dtype(self.compute_dtype)
        out_dt = jnp.dtype(self.out_dtype)

        # tm: sublane-pack aligned for small M (avoids masked stores), up to
        # 512 for large M.  No <=256 megacore cap: v5e/v6e are single-TC and on
        # v7x the N grid axis normally supplies the second parallel block.
        pack = {4: 8, 2: 16, 1: 32}.get(cmp_dt.itemsize, 8)
        m_p = _round_up(M, pack)
        if m_p <= 512:
            tm = m_p
        else:
            tm = _pick_div_tile(_round_up(M, 128), _TM_CANDIDATES)

        tn = self._tn_opts[0]
        tk = self._tk_opts[0]
        has_bias = self._bias_row is not None
        direct = out_dt == jnp.dtype(jnp.float32)

        def footprint(tk_, tn_):
            f = (
                2 * tm * tk_ * cmp_dt.itemsize   # x tiles (double-buffered)
                + 2 * tk_ * tn_ * cmp_dt.itemsize  # W tiles
                + 2 * tm * tn_ * out_dt.itemsize   # out tiles
            )
            if not direct:
                f += tm * tn_ * 4                  # f32 scratch accumulator
            if has_bias:
                f += 2 * tn_ * 4                   # bias row
            return f

        # Shrink tk, then tn, if over the generation-aware VMEM budget (rare:
        # even tm=512/tn=1024/tk=2048 bf16 is ~16 MiB << 48 MiB v7x budget).
        ki = ni = 0
        while footprint(tk, tn) > self._vmem_budget:
            if ki + 1 < len(self._tk_opts):
                ki += 1
                tk = self._tk_opts[ki]
            elif ni + 1 < len(self._tn_opts):
                ni += 1
                tn = self._tn_opts[ni]
            else:
                break

        fp = footprint(tk, tn)
        vmem_limit = int(
            min(max(int(fp * 1.25) + (2 << 20), 16 << 20), self._vmem_budget)
        )
        vmem_limit = max(vmem_limit, fp + (1 << 20))

        y = _linear_forward(
            x,
            self._w_t,
            self._bias_row,
            tm=tm,
            tn=tn,
            tk=tk,
            n_out=self.output_size,
            out_dtype=out_dt.name,
            compute_dtype=cmp_dt.name,
            vmem_limit=vmem_limit,
        )

        output_bias = self.bias if self.skip_bias_add else None
        return y, output_bias


if __name__ == "__main__":
    key = jax.random.PRNGKey(0)

    # --- test 1: default bf16-compute path, bias added --------------------
    batch, seq = 2, 8
    input_size, output_size = 128, 256
    x = jax.random.normal(key, (batch, seq, input_size), dtype=jnp.float32)

    layer = LinearBasePallas(
        input_size, output_size, bias=True, skip_bias_add=False, seed=0
    )
    y, out_bias = layer.forward(x)
    y = jax.block_until_ready(y)
    ref = x @ layer.weight.T + layer.bias
    assert y.shape == (batch, seq, output_size)
    assert y.dtype == jnp.float32
    assert out_bias is None
    # bf16 MXU inputs with f32 accumulation -> loose tolerance vs f32 reference.
    assert jnp.allclose(y, ref, atol=3e-2, rtol=3e-2)

    # --- test 2: skip_bias_add returns the bias separately ----------------
    layer_skip = LinearBasePallas(
        input_size, output_size, bias=True, skip_bias_add=True, seed=0
    )
    y2, out_bias2 = layer_skip.forward(x)
    y2 = jax.block_until_ready(y2)
    ref2 = x @ layer_skip.weight.T
    assert jnp.allclose(y2, ref2, atol=3e-2, rtol=3e-2)
    assert out_bias2 is not None
    assert jnp.allclose(out_bias2, layer_skip.bias)

    # --- test 3: exact f32 compute path, no bias, unaligned M/K/N ---------
    b3, s3, in3, out3 = 2, 7, 96, 200
    x3 = jax.random.normal(
        jax.random.PRNGKey(1), (b3, s3, in3), dtype=jnp.float32
    )
    layer3 = LinearBasePallas(
        in3, out3, bias=False, skip_bias_add=False,
        compute_dtype=jnp.float32, seed=3,
    )
    y3, out_bias3 = layer3.forward(x3)
    y3 = jax.block_until_ready(y3)
    ref3 = x3 @ layer3.weight.T
    assert y3.shape == (b3, s3, out3)
    assert out_bias3 is None
    assert jnp.allclose(y3, ref3, atol=1e-4, rtol=1e-4)

    # --- test 4: bf16 output dtype (scratch-accumulator kernel path) ------
    layer4 = LinearBasePallas(
        input_size, output_size, bias=True, skip_bias_add=False,
        out_dtype=jnp.bfloat16, seed=0,
    )
    y4, _ = layer4.forward(x)
    y4 = jax.block_until_ready(y4)
    assert y4.dtype == jnp.bfloat16
    ref4 = x @ layer4.weight.T + layer4.bias
    assert jnp.allclose(y4.astype(jnp.float32), ref4, atol=5e-2, rtol=5e-2)

    print("KERNEL_OK")
</pallas_src>

<mosaic_0001>
module attributes {stable_mosaic.version = 11 : i64} {
  func.func @_mm_bias_kernel_direct(%arg0: i32, %arg1: i32, %arg2: i32, %arg3: memref<16x128xbf16, #tpu.memory_space<vmem>>, %arg4: memref<128x256xbf16, #tpu.memory_space<vmem>>, %arg5: memref<1x256xf32, #tpu.memory_space<vmem>>, %arg6: memref<16x256xf32, #tpu.memory_space<vmem>>) attributes {dimension_semantics = [#tpu.dimension_semantics<parallel>, #tpu.dimension_semantics<parallel>, #tpu.dimension_semantics<arbitrary>], iteration_bounds = array<i64: 1, 1, 1>, scalar_prefetch = 0 : i64, scratch_operands = 0 : i64, tpu.core_type = #tpu.core_type<tc>, window_params = [{transform_indices = @transform_0, window_bounds = array<i64: 16, 128>}, {transform_indices = @transform_1, window_bounds = array<i64: 128, 256>}, {transform_indices = @transform_2, window_bounds = array<i64: 1, 256>}, {transform_indices = @transform_3, window_bounds = array<i64: 16, 256>}]} {
    %c0_i32 = arith.constant 0 : i32
    %0 = arith.cmpi eq, %arg2, %c0_i32 : i32
    %1 = arith.extui %0 : i1 to i32
    %c0_i32_0 = arith.constant 0 : i32
    %2 = arith.cmpi ne, %1, %c0_i32_0 : i32
    scf.if %2 {
      %c0_8 = arith.constant 0 : index
      %c0_9 = arith.constant 0 : index
      %9 = vector.load %arg5[%c0_8, %c0_9] : memref<1x256xf32, #tpu.memory_space<vmem>>, vector<1x256xf32>
      %10 = vector.shape_cast %9 : vector<1x256xf32> to vector<1x256xf32>
      %11 = vector.broadcast %10 : vector<1x256xf32> to vector<16x256xf32>
      %c0_10 = arith.constant 0 : index
      %c0_11 = arith.constant 0 : index
      %12 = vector.load %arg6[%c0_10, %c0_11] : memref<16x256xf32, #tpu.memory_space<vmem>>, vector<16x256xf32>
      tpu.vector_store %arg6[%c0_10, %c0_11], %11 {strides = array<i32>} : memref<16x256xf32, #tpu.memory_space<vmem>>, vector<16x256xf32>,
    } else {
    }
    %c0 = arith.constant 0 : index
    %c0_1 = arith.constant 0 : index
    %3 = vector.load %arg6[%c0, %c0_1] : memref<16x256xf32, #tpu.memory_space<vmem>>, vector<16x256xf32>
    %c0_2 = arith.constant 0 : index
    %c0_3 = arith.constant 0 : index
    %4 = vector.load %arg3[%c0_2, %c0_3] : memref<16x128xbf16, #tpu.memory_space<vmem>>, vector<16x128xbf16>
    %c0_4 = arith.constant 0 : index
    %c0_5 = arith.constant 0 : index
    %5 = vector.load %arg4[%c0_4, %c0_5] : memref<128x256xbf16, #tpu.memory_space<vmem>>, vector<128x256xbf16>
    %cst = arith.constant dense<0.000000e+00> : vector<16x256xf32>
    %6 = tpu.matmul %4, %5, %cst {dimension_numbers = #tpu.dot_dimension_numbers<[1], [0], [0], [1], [0, 0, 1, 1], [], []>} : vector<16x128xbf16>, vector<128x256xbf16>, vector<16x256xf32> -> vector<16x256xf32>
    %7 = arith.addf %3, %6 : vector<16x256xf32>
    %c0_6 = arith.constant 0 : index
    %c0_7 = arith.constant 0 : index
    %8 = vector.load %arg6[%c0_6, %c0_7] : memref<16x256xf32, #tpu.memory_space<vmem>>, vector<16x256xf32>
    tpu.vector_store %arg6[%c0_6, %c0_7], %7 {strides = array<i32>} : memref<16x256xf32, #tpu.memory_space<vmem>>, vector<16x256xf32>,
    return
  }
  func.func @transform_0(%arg0: i32, %arg1: i32, %arg2: i32) -> (i32, i32) {
    %c0_i32 = arith.constant 0 : i32
    return %arg0, %arg2 : i32, i32
  }
  func.func @transform_1(%arg0: i32, %arg1: i32, %arg2: i32) -> (i32, i32) {
    %c0_i32 = arith.constant 0 : i32
    return %arg2, %arg1 : i32, i32
  }
  func.func @transform_2(%arg0: i32, %arg1: i32, %arg2: i32) -> (i32, i32) {
    %c0_i32 = arith.constant 0 : i32
    %c0_i32_0 = arith.constant 0 : i32
    return %c0_i32, %arg1 : i32, i32
  }
  func.func @transform_3(%arg0: i32, %arg1: i32, %arg2: i32) -> (i32, i32) {
    %c0_i32 = arith.constant 0 : i32
    return %arg0, %arg1 : i32, i32
  }
}

</mosaic_0001>

<bundles_post_ra>
// kernel: _linear_forward.1
= control target key start
LH: loop header
LB: loop body
LE: loop exit
PB: predicated region body
PF: predicated region fallthrough
CT: control target
= control target key end

     0   :  { %8 = vsyncpa [#allocation3], 0  ;;  %s380_s0 = inlined_call_operand.vmem [shape: bf16[16,128], index: 0, kind: input, shape index: {}]   ;;  %s381_s1 = inlined_call_operand.hbm [shape: bf16[128,256], index: 1, kind: input, shape index: {}]   ;;  %s382_s2 = inlined_call_operand.vmem [shape: f32[1,256], index: 2, kind: input, shape index: {}]   ;;  %s383_s3 = inlined_call_operand.hbm [shape: f32[16,256], index: 3, kind: output, shape index: {}]  }
   0x1   :  { %9 = vsyncpa [#allocation4], 0  ;;  %s323_s12 = smov [#allocation2]   ;;  %s275_s16 = scalar_lea.hbm %s381_s1, 2048 }
   0x2   :  { %s17_s13 = sshll.u32 %s323_s12, 4  ;;  %p276_p0 = scmp.ne.s32.totalorder %s381_s1, %s275_s16  ;;  %s18_s13 = int_to_ptr.vmem [resolvable:$true] %s17_s13 }
   0x3   :  { %p279_p1 = scmp.lt.u32.totalorder %s275_s16, %s381_s1 }
   0x5   :  { %p281_p2 = pnand %p279_p1, %p276_p0 }
   0x7   :  { %284 = shalt.err (!%p281_p2)
}
   0x8   :  { %s285_s21 = scalar_lea.vmem %s18_s13, 2048  ;;  %p290_p4 = scmp.lt.s32.totalorder %s18_s13, %s18_s13 }
   0x9   :  { %p286_p3 = scmp.ne.s32.totalorder %s18_s13, %s285_s21  ;;  %p291_p5 = scmp.lt.s32.totalorder %s285_s21, %s285_s21 }
   0xb   :  { %p292_p6 = por %p291_p5, %p290_p4 }
   0xd   :  { %p293_p7 = pnand %p292_p6, %p286_p3 }
   0xf   :  { %296 = shalt.err (!%p293_p7)
}
  0x10   :  { %s324_s22 = smov 128   ;;  %s325_s23 = smov 8  }
  0x11   :  { %23 = dma.hbm_to_vmem [thread:$0]  %s381_s1, 2048, %s18_s13, [#allocation3], %s324_s22, %s324_s22, %s325_s23  }
  0x12   :  { %319 = dma.done.wait [#allocation3], 2048  }
  0x13   :  { %320 = vsyncadd [#allocation3], 4294965248  ;;  %v326_v0 = vmov 0   ;;  %v250_v1 = vld [vmem:[#allocation2 + $0x4] ss:$8 sps:$4 sm:$0xff]   ;;  %v36_v18 = vlaneseq  ;;  %s327_s29 = smov [#allocation5]  }
  0x14   :  { %190 = vmatprep.mubr.bf16.mxu0 %v326_v0  ;;  %v252_v2 = vld [vmem:[#allocation2] ss:$8 sps:$4 sm:$0xff]   ;;  %158 = vmatprep.subr.bf16.mxu0 %v250_v1  ;;  %v253_v3 = vld [vmem:[#allocation2 + $0x14] ss:$8 sps:$4 sm:$0xff]   ;;  %v255_v4 = vld [vmem:[#allocation2 + $0x10] ss:$8 sps:$4 sm:$0xff]  }
  0x15   :  { %159 = vmatpush1.bf16.msra.mxu0 %v252_v2  ;;  %v256_v5 = vld [vmem:[#allocation2 + $0x24] ss:$8 sps:$4 sm:$0xff]   ;;  %v258_v6 = vld [vmem:[#allocation2 + $0x20] ss:$8 sps:$4 sm:$0xff]   ;;  %v259_v7 = vld [vmem:[#allocation2 + $0x34] ss:$8 sps:$4 sm:$0xff]  }
  0x16   :  { %160 = vmatprep.subr.bf16.mxu0 %v253_v3  ;;  %v261_v8 = vld [vmem:[#allocation2 + $0x30] ss:$8 sps:$4 sm:$0xff]   ;;  %v262_v9 = vld [vmem:[#allocation2 + $0x44] ss:$8 sps:$4 sm:$0xff]   ;;  %v264_v10 = vld [vmem:[#allocation2 + $0x40] ss:$8 sps:$4 sm:$0xff]  }
  0x17   :  { %v265_v11 = vld [vmem:[#allocation2 + $0x54] ss:$8 sps:$4 sm:$0xff]   ;;  %v267_v12 = vld [vmem:[#allocation2 + $0x50] ss:$8 sps:$4 sm:$0xff]   ;;  %v268_v13 = vld [vmem:[#allocation2 + $0x64] ss:$8 sps:$4 sm:$0xff]  }
  0x18   :  { %v270_v14 = vld [vmem:[#allocation2 + $0x60] ss:$8 sps:$4 sm:$0xff]   ;;  %v271_v15 = vld [vmem:[#allocation2 + $0x74] ss:$8 sps:$4 sm:$0xff]   ;;  %v273_v16 = vld [vmem:[#allocation2 + $0x70] ss:$8 sps:$4 sm:$0xff]  }
  0x19   :  { %161 = vmatpush1.bf16.msra.mxu0 %v255_v4  ;;  %v274_v17 = vld [vmem:[%s380_s0] sm:$0xff]   ;;  %v37_v19 = vshrl.u32 %v36_v18, 7  ;;  %s214_s30 = sshll.u32 %s327_s29, 4  ;;  %s215_s30 = int_to_ptr.vmem [resolvable:$true] %s214_s30 }
  0x1a   :  { %162 = vmatprep.subr.bf16.mxu0 %v256_v5  ;;  %v34_v21 = vld [vmem:[%s382_s2] sm:$0x3]  ;;  %s297_s0 = scalar_lea.vmem %s215_s30, 512  ;;  %p302_p9 = scmp.lt.s32.totalorder %s215_s30, %s215_s30 }
  0x1b   :  { %v38_v20 = vsub.s32 0, %v37_v19  ;;  %v42_v22 = vsub.s32 1, %v37_v19  ;;  %p298_p8 = scmp.ne.s32.totalorder %s215_s30, %s297_s0  ;;  %p303_p10 = scmp.lt.s32.totalorder %s297_s0, %s297_s0 }
  0x1d   :  { %163 = vmatpush1.bf16.msra.mxu0 %v258_v6  ;;  %v39_v23 = vrot.slane %v34_v21, %v38_v20  ;;  %v43_v24 = vrot.slane %v34_v21, %v42_v22  ;;  %p304_p11 = por %p303_p10, %p302_p9 }
  0x1e   :  { %164 = vmatprep.subr.bf16.mxu0 %v259_v7 }
  0x1f   :  { %p305_p12 = pnand %p304_p11, %p298_p8 }
  0x21   :  { %165 = vmatpush1.bf16.msra.mxu0 %v261_v8 }
  0x22   :  { %166 = vmatprep.subr.bf16.mxu0 %v262_v9 }
  0x25   :  { %167 = vmatpush1.bf16.msra.mxu0 %v264_v10 }
  0x26   :  { %168 = vmatprep.subr.bf16.mxu0 %v265_v11 }
  0x29   :  { %169 = vmatpush1.bf16.msra.mxu0 %v267_v12 }
  0x2a   :  { %170 = vmatprep.subr.bf16.mxu0 %v268_v13 }
  0x2d   :  { %171 = vmatpush1.bf16.msra.mxu0 %v270_v14 }
  0x2e   :  { %172 = vmatprep.subr.bf16.mxu0 %v271_v15 }
  0x31   :  { %173 = vmatpush1.bf16.msra.mxu0 %v273_v16 }
  0x34   :  { %191 = vmatmul.mubr.bf16.vlgmr.msra.gmra.mrb[0].mxu0 %v274_v17 }
 0x107   :  { %v192_v25 = vpop.f32.mrb[0].mxu0 }
 0x108   :  { %v201_v26 = vadd.f32 %v192_v25, %v39_v23  ;;  %v194_v27 = vpop.f32.mrb[1].mxu0 }
 0x109   :  { %v202_v28 = vadd.f32 %v194_v27, %v43_v24  ;;  %v196_v29 = vpop.f32.mrb[2].mxu0 }
 0x10a   :  { %205 = vst [vmem:[#allocation5] sm:$0xff] %v201_v26  ;;  %v203_v30 = vadd.f32 %v196_v29, %v39_v23  ;;  %v198_v31 = vpop.f32.mrb[3].mxu0 }
 0x10b   :  { %206 = vst [vmem:[#allocation5 + $0x8] sm:$0xff] %v202_v28  ;;  %v204_v32 = vadd.f32 %v198_v31, %v43_v24 }
 0x10c   :  { %207 = vst [vmem:[#allocation5 + $0x10] sm:$0xff] %v203_v30 }
 0x10d   :  { %208 = vst [vmem:[#allocation5 + $0x18] sm:$0xff] %v204_v32 }
 0x10e   :  { %308 = shalt.err (!%p305_p12)
}
 0x10f   :  { %s309_s5 = scalar_lea.hbm %s383_s3, 512 }
 0x110   :  { %p310_p13 = scmp.ne.s32.totalorder %s383_s3, %s309_s5  ;;  %p313_p0 = scmp.lt.u32.totalorder %s309_s5, %s383_s3 }
 0x112   :  { %p315_p1 = pnand %p313_p0, %p310_p13 }
 0x114   :  { %318 = shalt.err (!%p315_p1)
}
 0x115   :  { %s328_s10 = smov 256   ;;  %s329_s11 = smov 16  }
 0x116   :  { %220 = dma.vmem_to_hbm [thread:$0]  %s215_s30, 512, %s383_s3, [#allocation4], %s328_s10, %s328_s10, %s329_s11  }
 0x117   :  { %321 = dma.done.wait [#allocation4], 512  }
 0x118   :  { %322 = vsyncadd [#allocation4], 4294966784 }
 0x119   :  { %224 = vsyncpa [#allocation3], 1 }
 0x11a   :  { %225 = vsyncpa [#allocation4], 1 }

</bundles_post_ra>
